<compile_context>
chip_gen: v6e
topology: v6e:2x2x1
jax: 0.10.0
libtpu: 0.0.40
codegen_flags: <defaults>
</compile_context>

<pallas_src>
import jax
import jax.numpy as jnp
from jax.experimental import pallas as pl
from jax.experimental.pallas import tpu as pltpu

IN_F = 32 * 32 * 3          # 3072
H1, H2, OUT = 120, 84, 10
H1_PAD, H2_PAD = 128, 128   # lane-aligned hidden dims


def _round_up(n, m):
    return ((n + m - 1) // m) * m


def _tile_config():
    """Pick (tile_b cap, vmem_limit_bytes) per TPU generation.

    x is streamed as f32 (12 KiB/row) and cast to bf16 in-kernel, so VMEM use
    is ~32 KiB/row (double-buffered f32 x tile + bf16 copy + f32 hiddens) plus
    ~1.7 MiB of resident weights.
      * 128 MiB-VMEM chips (v5e/v6e): TILE_B=2048 -> ~66 MiB, limit 80 MiB.
      * 64 MiB-per-TC chips (v7x) / fallback: TILE_B=1024 -> ~34 MiB, 48 MiB.
    """
    try:
        phys = pltpu.get_tpu_info().vmem_capacity_bytes
    except Exception:
        phys = 64 << 20  # conservative fallback (v7x per-TC)
    if phys >= (100 << 20):
        return 2048, 80 << 20
    return 1024, 48 << 20


def boringnet3_kernel(x_ref, w1_ref, b1_ref, w2_ref, b2_ref, w3_ref, b3_ref,
                      o_ref):
    # f32 -> bf16 cast on the VPU; fully hidden under the (dominant) x DMA.
    x = x_ref[...].astype(jnp.bfloat16)                         # (TB, 3072)

    # fc1 + relu  (bf16 operands, f32 accumulate)
    h1 = jnp.dot(x, w1_ref[...], preferred_element_type=jnp.float32)
    h1 = jnp.maximum(h1 + b1_ref[...], 0.0)                     # (TB, 128) f32

    # fc2 + relu
    h2 = jnp.dot(h1.astype(jnp.bfloat16), w2_ref[...],
                 preferred_element_type=jnp.float32)
    h2 = jnp.maximum(h2 + b2_ref[...], 0.0)                     # (TB, 128) f32

    # fc3 + logsigmoid
    z = jnp.dot(h2.astype(jnp.bfloat16), w3_ref[...],
                preferred_element_type=jnp.float32)
    z = z + b3_ref[...]                                         # (TB, 10)

    # numerically-stable log(sigmoid(z)) = min(z, 0) - log1p(exp(-|z|))
    o_ref[...] = jnp.minimum(z, 0.0) - jnp.log1p(jnp.exp(-jnp.abs(z)))


def _pad_to(a, shape):
    # NOTE: zero padding is load-bearing — padded weight columns AND padded
    # bias entries must be exactly 0 so relu keeps padded hidden lanes at 0.
    return jnp.pad(a, [(0, t - s) for s, t in zip(a.shape, shape)])


def prepare_params(params):
    """Pad hidden dims to 128 lanes; weights -> bf16, biases stay f32."""
    w1, b1, w2, b2, w3, b3 = params
    w1p = _pad_to(w1, (IN_F, H1_PAD)).astype(jnp.bfloat16)
    b1p = _pad_to(b1.reshape(1, -1), (1, H1_PAD)).astype(jnp.float32)
    w2p = _pad_to(w2, (H1_PAD, H2_PAD)).astype(jnp.bfloat16)
    b2p = _pad_to(b2.reshape(1, -1), (1, H2_PAD)).astype(jnp.float32)
    w3p = _pad_to(w3, (H2_PAD, OUT)).astype(jnp.bfloat16)
    b3p = b3.reshape(1, -1).astype(jnp.float32)
    return w1p, b1p, w2p, b2p, w3p, b3p


@jax.jit
def boringnet3_forward(x_nchw, params):
    B = x_nchw.shape[0]
    w1p, b1p, w2p, b2p, w3p, b3p = prepare_params(params)

    # Copy-free view (contiguous NCHW row-major == torch's x.view(-1, 3072)).
    # x stays f32 in HBM; the bf16 cast happens inside the kernel.
    x_flat = x_nchw.reshape(B, IN_F)

    tile_cap, vmem_limit = _tile_config()
    # 16-row alignment (bf16 sublane packing); aim for >=2 grid steps so the
    # 'parallel' batch axis can shard across v7x's two TensorCores.
    tile_b = min(tile_cap, max(16, _round_up(pl.cdiv(B, 2), 16)))
    num_tiles = pl.cdiv(B, tile_b)   # ragged last tile: Pallas masks the store

    resident = lambda i: (0, 0)      # weights/biases: same block every step

    cost = pl.CostEstimate(
        flops=2 * B * (IN_F * H1_PAD + H1_PAD * H2_PAD + H2_PAD * OUT),
        transcendentals=2 * B * OUT,
        bytes_accessed=(B * IN_F * 4 + B * OUT * 4
                        + (IN_F * H1_PAD + H1_PAD * H2_PAD + H2_PAD * OUT) * 2
                        + (H1_PAD + H2_PAD + OUT) * 4),
    )

    out = pl.pallas_call(
        boringnet3_kernel,
        out_shape=jax.ShapeDtypeStruct((B, OUT), jnp.float32),
        grid=(num_tiles,),
        in_specs=[
            pl.BlockSpec((tile_b, IN_F), lambda i: (i, 0)),  # x: streamed f32
            pl.BlockSpec((IN_F, H1_PAD), resident),
            pl.BlockSpec((1, H1_PAD), resident),
            pl.BlockSpec((H1_PAD, H2_PAD), resident),
            pl.BlockSpec((1, H2_PAD), resident),
            pl.BlockSpec((H2_PAD, OUT), resident),
            pl.BlockSpec((1, OUT), resident),
        ],
        out_specs=pl.BlockSpec((tile_b, OUT), lambda i: (i, 0)),
        compiler_params=pltpu.CompilerParams(
            dimension_semantics=("parallel",),
            vmem_limit_bytes=vmem_limit),
        cost_estimate=cost,
    )(x_flat, w1p, b1p, w2p, b2p, w3p, b3p)

    return out


def init_params(key):
    """Deterministic init mimicking nn.Linear default (uniform +-1/sqrt(fan_in)).

    Weights are stored already transposed: (in_features, out_features)."""
    dims = [(IN_F, H1), (H1, H2), (H2, OUT)]
    params = []
    keys = jax.random.split(key, 2 * len(dims))
    for i, (fan_in, fan_out) in enumerate(dims):
        bound = 1.0 / jnp.sqrt(jnp.float32(fan_in))
        w = jax.random.uniform(keys[2 * i], (fan_in, fan_out),
                               minval=-bound, maxval=bound, dtype=jnp.float32)
        b = jax.random.uniform(keys[2 * i + 1], (fan_out,),
                               minval=-bound, maxval=bound, dtype=jnp.float32)
        params += [w, b]
    return tuple(params)


def ref_bf16(x_nchw, params):
    """Plain-JAX reference mirroring the kernel's bf16 datapath exactly."""
    w1p, b1p, w2p, b2p, w3p, b3p = prepare_params(params)
    xf = x_nchw.reshape(x_nchw.shape[0], IN_F).astype(jnp.bfloat16)
    h1 = jnp.maximum(
        jnp.dot(xf, w1p, preferred_element_type=jnp.float32) + b1p, 0.0)
    h2 = jnp.maximum(
        jnp.dot(h1.astype(jnp.bfloat16), w2p,
                preferred_element_type=jnp.float32) + b2p, 0.0)
    z = jnp.dot(h2.astype(jnp.bfloat16), w3p,
                preferred_element_type=jnp.float32) + b3p
    return jnp.minimum(z, 0.0) - jnp.log1p(jnp.exp(-jnp.abs(z)))


def ref_f32(x_nchw, params):
    """Full-precision reference (matches the original torch module)."""
    w1, b1, w2, b2, w3, b3 = params
    xf = x_nchw.reshape(x_nchw.shape[0], -1)
    h = jax.nn.relu(xf @ w1 + b1)
    h = jax.nn.relu(h @ w2 + b2)
    return jax.nn.log_sigmoid(h @ w3 + b3)


if __name__ == "__main__":
    key = jax.random.PRNGKey(0)
    k_x, k_p = jax.random.split(key)

    # Small batch; spatial dims must be 32x32x3 because fc1 expects 3072 feats.
    x = jax.random.normal(k_x, (2, 3, 32, 32), dtype=jnp.float32)  # NCHW
    params = init_params(k_p)

    out = boringnet3_forward(x, params)
    jax.block_until_ready(out)

    assert out.shape == (2, 10)
    assert bool(jnp.all(out <= 0.0))          # logsigmoid output is always <= 0

    # Tight check against a bf16-matched reference (same datapath as kernel).
    assert bool(jnp.allclose(out, ref_bf16(x, params), atol=5e-4, rtol=5e-4))
    # Loose sanity check against the f32 torch-equivalent reference
    # (bf16 x/weight streaming introduces ~1e-2-scale deviations by design).
    assert bool(jnp.allclose(out, ref_f32(x, params), atol=1e-1, rtol=0.0))

    # Exercise a batch that is NOT a multiple of the tile (ragged last tile).
    x2 = jax.random.normal(k_x, (37, 3, 32, 32), dtype=jnp.float32)
    out2 = boringnet3_forward(x2, params)
    jax.block_until_ready(out2)
    assert out2.shape == (37, 10)
    assert bool(jnp.allclose(out2, ref_bf16(x2, params), atol=5e-4, rtol=5e-4))

    print("KERNEL_OK")
</pallas_src>

<mosaic_0001>
module attributes {stable_mosaic.version = 11 : i64} {
  func.func @boringnet3_kernel(%arg0: i32, %arg1: memref<16x3072xf32, #tpu.memory_space<vmem>>, %arg2: memref<3072x128xbf16, #tpu.memory_space<vmem>>, %arg3: memref<1x128xf32, #tpu.memory_space<vmem>>, %arg4: memref<128x128xbf16, #tpu.memory_space<vmem>>, %arg5: memref<1x128xf32, #tpu.memory_space<vmem>>, %arg6: memref<128x10xbf16, #tpu.memory_space<vmem>>, %arg7: memref<1x10xf32, #tpu.memory_space<vmem>>, %arg8: memref<16x10xf32, #tpu.memory_space<vmem>>) attributes {dimension_semantics = [#tpu.dimension_semantics<parallel>], iteration_bounds = array<i64: 1>, scalar_prefetch = 0 : i64, scratch_operands = 0 : i64, tpu.core_type = #tpu.core_type<tc>, window_params = [{transform_indices = @transform_0, window_bounds = array<i64: 16, 3072>}, {pipeline_mode = #tpu.pipeline_mode<synchronous>, transform_indices = @transform_1, window_bounds = array<i64: 3072, 128>}, {pipeline_mode = #tpu.pipeline_mode<synchronous>, transform_indices = @transform_2, window_bounds = array<i64: 1, 128>}, {pipeline_mode = #tpu.pipeline_mode<synchronous>, transform_indices = @transform_3, window_bounds = array<i64: 128, 128>}, {pipeline_mode = #tpu.pipeline_mode<synchronous>, transform_indices = @transform_4, window_bounds = array<i64: 1, 128>}, {pipeline_mode = #tpu.pipeline_mode<synchronous>, transform_indices = @transform_5, window_bounds = array<i64: 128, 10>}, {pipeline_mode = #tpu.pipeline_mode<synchronous>, transform_indices = @transform_6, window_bounds = array<i64: 1, 10>}, {transform_indices = @transform_7, window_bounds = array<i64: 16, 10>}]} {
    %c0 = arith.constant 0 : index
    %c0_0 = arith.constant 0 : index
    %0 = vector.load %arg1[%c0, %c0_0] : memref<16x3072xf32, #tpu.memory_space<vmem>>, vector<16x3072xf32>
    %1 = arith.truncf %0 : vector<16x3072xf32> to vector<16x3072xbf16>
    %c0_1 = arith.constant 0 : index
    %c0_2 = arith.constant 0 : index
    %2 = vector.load %arg2[%c0_1, %c0_2] : memref<3072x128xbf16, #tpu.memory_space<vmem>>, vector<3072x128xbf16>
    %cst = arith.constant dense<0.000000e+00> : vector<16x128xf32>
    %3 = tpu.matmul %1, %2, %cst {dimension_numbers = #tpu.dot_dimension_numbers<[1], [0], [0], [1], [0, 0, 1, 1], [], []>} : vector<16x3072xbf16>, vector<3072x128xbf16>, vector<16x128xf32> -> vector<16x128xf32>
    %c0_3 = arith.constant 0 : index
    %c0_4 = arith.constant 0 : index
    %4 = vector.load %arg3[%c0_3, %c0_4] : memref<1x128xf32, #tpu.memory_space<vmem>>, vector<1x128xf32>
    %5 = vector.broadcast %4 : vector<1x128xf32> to vector<16x128xf32>
    %6 = arith.addf %3, %5 : vector<16x128xf32>
    %cst_5 = arith.constant 0.000000e+00 : f32
    %7 = vector.broadcast %cst_5 : f32 to vector<16x128xf32>
    %8 = arith.maximumf %6, %7 : vector<16x128xf32>
    %9 = arith.truncf %8 : vector<16x128xf32> to vector<16x128xbf16>
    %c0_6 = arith.constant 0 : index
    %c0_7 = arith.constant 0 : index
    %10 = vector.load %arg4[%c0_6, %c0_7] : memref<128x128xbf16, #tpu.memory_space<vmem>>, vector<128x128xbf16>
    %cst_8 = arith.constant dense<0.000000e+00> : vector<16x128xf32>
    %11 = tpu.matmul %9, %10, %cst_8 {dimension_numbers = #tpu.dot_dimension_numbers<[1], [0], [0], [1], [0, 0, 1, 1], [], []>} : vector<16x128xbf16>, vector<128x128xbf16>, vector<16x128xf32> -> vector<16x128xf32>
    %c0_9 = arith.constant 0 : index
    %c0_10 = arith.constant 0 : index
    %12 = vector.load %arg5[%c0_9, %c0_10] : memref<1x128xf32, #tpu.memory_space<vmem>>, vector<1x128xf32>
    %13 = vector.broadcast %12 : vector<1x128xf32> to vector<16x128xf32>
    %14 = arith.addf %11, %13 : vector<16x128xf32>
    %cst_11 = arith.constant 0.000000e+00 : f32
    %15 = vector.broadcast %cst_11 : f32 to vector<16x128xf32>
    %16 = arith.maximumf %14, %15 : vector<16x128xf32>
    %17 = arith.truncf %16 : vector<16x128xf32> to vector<16x128xbf16>
    %c0_12 = arith.constant 0 : index
    %c0_13 = arith.constant 0 : index
    %18 = vector.load %arg6[%c0_12, %c0_13] : memref<128x10xbf16, #tpu.memory_space<vmem>>, vector<128x10xbf16>
    %cst_14 = arith.constant dense<0.000000e+00> : vector<16x10xf32>
    %19 = tpu.matmul %17, %18, %cst_14 {dimension_numbers = #tpu.dot_dimension_numbers<[1], [0], [0], [1], [0, 0, 1, 1], [], []>} : vector<16x128xbf16>, vector<128x10xbf16>, vector<16x10xf32> -> vector<16x10xf32>
    %c0_15 = arith.constant 0 : index
    %c0_16 = arith.constant 0 : index
    %20 = vector.load %arg7[%c0_15, %c0_16] : memref<1x10xf32, #tpu.memory_space<vmem>>, vector<1x10xf32>
    %21 = vector.broadcast %20 : vector<1x10xf32> to vector<16x10xf32>
    %22 = arith.addf %19, %21 : vector<16x10xf32>
    %cst_17 = arith.constant 0.000000e+00 : f32
    %23 = vector.broadcast %cst_17 : f32 to vector<16x10xf32>
    %24 = arith.minimumf %22, %23 : vector<16x10xf32>
    %25 = math.absf %22 : vector<16x10xf32>
    %cst_18 = arith.constant 0.000000e+00 : f32
    %26 = vector.broadcast %cst_18 : f32 to vector<16x10xf32>
    %27 = arith.subf %26, %25 : vector<16x10xf32>
    %28 = math.exp %27 : vector<16x10xf32>
    %29 = math.log1p %28 : vector<16x10xf32>
    %30 = arith.subf %24, %29 : vector<16x10xf32>
    %c0_19 = arith.constant 0 : index
    %c0_20 = arith.constant 0 : index
    %31 = vector.load %arg8[%c0_19, %c0_20] : memref<16x10xf32, #tpu.memory_space<vmem>>, vector<16x10xf32>
    tpu.vector_store %arg8[%c0_19, %c0_20], %30 {strides = array<i32>} : memref<16x10xf32, #tpu.memory_space<vmem>>, vector<16x10xf32>,
    return
  }
  func.func @transform_0(%arg0: i32) -> (i32, i32) {
    %c0_i32 = arith.constant 0 : i32
    %c0_i32_0 = arith.constant 0 : i32
    return %arg0, %c0_i32 : i32, i32
  }
  func.func @transform_1(%arg0: i32) -> (i32, i32) {
    %c0_i32 = arith.constant 0 : i32
    %c0_i32_0 = arith.constant 0 : i32
    %c0_i32_1 = arith.constant 0 : i32
    return %c0_i32, %c0_i32_0 : i32, i32
  }
  func.func @transform_2(%arg0: i32) -> (i32, i32) {
    %c0_i32 = arith.constant 0 : i32
    %c0_i32_0 = arith.constant 0 : i32
    %c0_i32_1 = arith.constant 0 : i32
    return %c0_i32, %c0_i32_0 : i32, i32
  }
  func.func @transform_3(%arg0: i32) -> (i32, i32) {
    %c0_i32 = arith.constant 0 : i32
    %c0_i32_0 = arith.constant 0 : i32
    %c0_i32_1 = arith.constant 0 : i32
    return %c0_i32, %c0_i32_0 : i32, i32
  }
  func.func @transform_4(%arg0: i32) -> (i32, i32) {
    %c0_i32 = arith.constant 0 : i32
    %c0_i32_0 = arith.constant 0 : i32
    %c0_i32_1 = arith.constant 0 : i32
    return %c0_i32, %c0_i32_0 : i32, i32
  }
  func.func @transform_5(%arg0: i32) -> (i32, i32) {
    %c0_i32 = arith.constant 0 : i32
    %c0_i32_0 = arith.constant 0 : i32
    %c0_i32_1 = arith.constant 0 : i32
    return %c0_i32, %c0_i32_0 : i32, i32
  }
  func.func @transform_6(%arg0: i32) -> (i32, i32) {
    %c0_i32 = arith.constant 0 : i32
    %c0_i32_0 = arith.constant 0 : i32
    %c0_i32_1 = arith.constant 0 : i32
    return %c0_i32, %c0_i32_0 : i32, i32
  }
  func.func @transform_7(%arg0: i32) -> (i32, i32) {
    %c0_i32 = arith.constant 0 : i32
    %c0_i32_0 = arith.constant 0 : i32
    return %arg0, %c0_i32 : i32, i32
  }
}

</mosaic_0001>

<bundles_post_ra>
// kernel: boringnet3_forward.1
= control target key start
LH: loop header
LB: loop body
LE: loop exit
PB: predicated region body
PF: predicated region fallthrough
CT: control target
= control target key end

     0   :  { %12 = vsyncpa [#allocation3], 0  ;;  %v131_v29 = vlaneseq  ;;  %v3791_v33 = vmov 1983009808   ;;  %vm3793_vm0 = vmmov 0   ;;  %vm2923_vm2 = vcmask 80896   ;;  %s4685_s0 = inlined_call_operand.vmem [shape: f32[2,3072], index: 0, kind: input, shape index: {}]   ;;  %s4686_s1 = inlined_call_operand.vmem [shape: bf16[3072,128], index: 1, kind: input, shape index: {}]   ;;  %s4687_s2 = inlined_call_operand.vmem [shape: f32[1,128], index: 2, kind: input, shape index: {}]   ;;  %s4688_s3 = inlined_call_operand.vmem [shape: bf16[128,128], index: 3, kind: input, shape index: {}]   ;;  %s4689_s4 = inlined_call_operand.vmem [shape: f32[1,128], index: 4, kind: input, shape index: {}]   ;;  %s4690_s5 = inlined_call_operand.vmem [shape: bf16[128,10], index: 5, kind: input, shape index: {}]   ;;  %s4691_s6 = inlined_call_operand.vmem [shape: f32[1,10], index: 6, kind: input, shape index: {}]   ;;  %s4692_s7 = inlined_call_operand.hbm [shape: f32[2,10], index: 7, kind: output, shape index: {}]  }
   0x1   :  { %v3481_v0 = vld [vmem:[%s4686_s1 + $0x78] sm:$0xff]   ;;  %v3485_v4 = vld [vmem:[%s4686_s1 + $0x70] sm:$0xff]   ;;  %v3489_v8 = vld [vmem:[%s4686_s1 + $0x68] sm:$0xff]   ;;  %v129_v34 = vunpack.c.l.s4 %v3791_v33 }
   0x2   :  { %v3482_v1 = vld [vmem:[%s4686_s1 + $0xf8] sm:$0xff]   ;;  %3153 = vmatprep.subr.bf16.mxu0 %v3481_v0  ;;  %v3486_v5 = vld [vmem:[%s4686_s1 + $0xf0] sm:$0xff]   ;;  %v3490_v9 = vld [vmem:[%s4686_s1 + $0xe8] sm:$0xff]   ;;  %v132_v35 = vshrl.u32 %v131_v29, 7 }
   0x3   :  { %v3483_v2 = vld [vmem:[%s4686_s1 + $0x38] sm:$0xff]   ;;  %3175 = vmatprep.subr.bf16.mxu1 %v3482_v1  ;;  %v3487_v6 = vld [vmem:[%s4686_s1 + $0x30] sm:$0xff]   ;;  %v3491_v10 = vld [vmem:[%s4686_s1 + $0x28] sm:$0xff]   ;;  %v130_v38 = vunpack.c.0.s8 %v129_v34 }
   0x4   :  { %v3484_v3 = vld [vmem:[%s4686_s1 + $0xb8] sm:$0xff]   ;;  %3154 = vmatpush3.bf16.msra.mxu0 %v3483_v2  ;;  %v3488_v7 = vld [vmem:[%s4686_s1 + $0xb0] sm:$0xff]   ;;  %v3492_v11 = vld [vmem:[%s4686_s1 + $0xa8] sm:$0xff]  }
   0x5   :  { %3176 = vmatpush3.bf16.msra.mxu1 %v3484_v3  ;;  %3155 = vmatprep.subr.bf16.mxu0 %v3485_v4  ;;  %v3493_v12 = vld [vmem:[%s4686_s1 + $0x60] sm:$0xff]   ;;  %v3497_v16 = vld [vmem:[%s4686_s1 + $0x58] sm:$0xff]   ;;  %v3501_v20 = vld [vmem:[%s4686_s1 + $0x50] sm:$0xff]   ;;  %v3951_v43 = vsub.s32 %v130_v38, %v132_v35 }
   0x6   :  { %3177 = vmatprep.subr.bf16.mxu1 %v3486_v5  ;;  %v3494_v13 = vld [vmem:[%s4686_s1 + $0xe0] sm:$0xff]   ;;  %v3498_v17 = vld [vmem:[%s4686_s1 + $0xd8] sm:$0xff]   ;;  %v3502_v21 = vld [vmem:[%s4686_s1 + $0xd0] sm:$0xff]  }
   0x7   :  { %v3495_v14 = vld [vmem:[%s4686_s1 + $0x20] sm:$0xff]   ;;  %v3499_v18 = vld [vmem:[%s4686_s1 + $0x18] sm:$0xff]   ;;  %v3503_v22 = vld [vmem:[%s4686_s1 + $0x10] sm:$0xff]  }
   0x8   :  { %3156 = vmatpush3.bf16.msra.mxu0 %v3487_v6  ;;  %v3496_v15 = vld [vmem:[%s4686_s1 + $0xa0] sm:$0xff]   ;;  %v3500_v19 = vld [vmem:[%s4686_s1 + $0x98] sm:$0xff]   ;;  %v3504_v23 = vld [vmem:[%s4686_s1 + $0x90] sm:$0xff]  }
   0x9   :  { %3178 = vmatpush3.bf16.msra.mxu1 %v3488_v7  ;;  %3157 = vmatprep.subr.bf16.mxu0 %v3489_v8  ;;  %v3505_v24 = vld [vmem:[%s4686_s1 + $0x48] sm:$0xff]   ;;  %v3509_v28 = vld [vmem:[%s4686_s1 + $0x40] sm:$0xff]   ;;  %v3525_v46 = vld [vmem:[%s4686_s1 + $0x178] sm:$0xff]  }
   0xa   :  { %3179 = vmatprep.subr.bf16.mxu1 %v3490_v9  ;;  %v3506_v25 = vld [vmem:[%s4686_s1 + $0xc8] sm:$0xff]   ;;  %v3510_v30 = vld [vmem:[%s4686_s1 + $0xc0] sm:$0xff]   ;;  %v3526_v51 = vld [vmem:[%s4686_s1 + $0x1f8] sm:$0xff]  }
   0xb   :  { %v3507_v26 = vld [vmem:[%s4686_s1 + $0x8] sm:$0xff]   ;;  %v3511_v31 = vld [vmem:[%s4686_s1] sm:$0xff]   ;;  %v3527_v60 = vld [vmem:[%s4686_s1 + $0x138] sm:$0xff]  }
   0xc   :  { %3158 = vmatpush3.bf16.msra.mxu0 %v3491_v10  ;;  %v3508_v27 = vld [vmem:[%s4686_s1 + $0x88] sm:$0xff]   ;;  %v3512_v32 = vld [vmem:[%s4686_s1 + $0x80] sm:$0xff]   ;;  %v3528_v1 = vld [vmem:[%s4686_s1 + $0x1b8] sm:$0xff]  }
   0xd   :  { %3180 = vmatpush3.bf16.msra.mxu1 %v3492_v11  ;;  %3159 = vmatprep.subr.bf16.mxu0 %v3493_v12  ;;  %v3513_v36 = vld [vmem:[%s4685_s0] ss:$48 sps:$4 sm:$0xff]   ;;  %v3521_v41 = vld [vmem:[%s4685_s0 + $0x4] ss:$48 sps:$4 sm:$0xff]   ;;  %v3533_v10 = vld [vmem:[%s4686_s1 + $0x168] sm:$0xff]  }
   0xe   :  { %3181 = vmatprep.subr.bf16.mxu1 %v3494_v13  ;;  %v3515_v37 = vld [vmem:[%s4685_s0 + $0x60] ss:$48 sps:$4 sm:$0xff]   ;;  %v3522_v42 = vld [vmem:[%s4685_s0 + $0x64] ss:$48 sps:$4 sm:$0xff]   ;;  %v134_v47 = vrot.slane %v3513_v36, %v3951_v43  ;;  %v141_v52 = vrot.slane %v3521_v41, %v3951_v43  ;;  %v3534_v11 = vld [vmem:[%s4686_s1 + $0x1e8] sm:$0xff]  }
   0xf   :  { %v3517_v39 = vld [vmem:[%s4685_s0 + $0xc0] ss:$48 sps:$4 sm:$0xff]   ;;  %v3523_v44 = vld [vmem:[%s4685_s0 + $0xc4] ss:$48 sps:$4 sm:$0xff]   ;;  %v148_v48 = vrot.slane %v3515_v37, %v3951_v43  ;;  %v155_v53 = vrot.slane %v3522_v42, %v3951_v43  ;;  %v3535_v12 = vld [vmem:[%s4686_s1 + $0x128] sm:$0xff]  }
  0x10   :  { %3160 = vmatpush3.bf16.msra.mxu0 %v3495_v14  ;;  %v3519_v40 = vld [vmem:[%s4685_s0 + $0x120] ss:$48 sps:$4 sm:$0xff]   ;;  %v3524_v45 = vld [vmem:[%s4685_s0 + $0x124] ss:$48 sps:$4 sm:$0xff]   ;;  %v350_v49 = vrot.slane %v3517_v39, %v3951_v43  ;;  %v357_v54 = vrot.slane %v3523_v44, %v3951_v43  ;;  %v3536_v13 = vld [vmem:[%s4686_s1 + $0x1a8] sm:$0xff]  }
  0x11   :  { %3182 = vmatpush3.bf16.msra.mxu1 %v3496_v15  ;;  %3161 = vmatprep.subr.bf16.mxu0 %v3497_v16  ;;  %v364_v50 = vrot.slane %v3519_v40, %v3951_v43  ;;  %v371_v55 = vrot.slane %v3524_v45, %v3951_v43  ;;  %v157_v56 = vcombine.high %v134_v47, %v148_v48  ;;  %v3529_v4 = vld [vmem:[%s4686_s1 + $0x170] sm:$0xff]   ;;  %v3537_v14 = vld [vmem:[%s4686_s1 + $0x160] sm:$0xff]   ;;  %v3552_v29 = vld [vmem:[%s4686_s1 + $0x188] sm:$0xff]  }
  0x12   :  { %3183 = vmatprep.subr.bf16.mxu1 %v3498_v17  ;;  %v156_v58 = vcombine.low %v134_v47, %v148_v48  ;;  %v159_v61 = vcombine.high %v141_v52, %v155_v53  ;;  %v158_v63 = vcombine.low %v141_v52, %v155_v53  ;;  %v3530_v7 = vld [vmem:[%s4686_s1 + $0x1f0] sm:$0xff]   ;;  %v3538_v15 = vld [vmem:[%s4686_s1 + $0x1e0] sm:$0xff]   ;;  %v3557_v34 = vld [vmem:[%s4685_s0 + $0x8] ss:$48 sps:$4 sm:$0xff]  }
  0x13   :  { %v373_v57 = vcombine.high %v350_v49, %v364_v50  ;;  %v372_v59 = vcombine.low %v350_v49, %v364_v50  ;;  %v375_v62 = vcombine.high %v357_v54, %v371_v55  ;;  %v374_v0 = vcombine.low %v357_v54, %v371_v55  ;;  %v3531_v8 = vld [vmem:[%s4686_s1 + $0x130] sm:$0xff]   ;;  %v3539_v16 = vld [vmem:[%s4686_s1 + $0x120] sm:$0xff]   ;;  %v3559_v35 = vld [vmem:[%s4685_s0 + $0x68] ss:$48 sps:$4 sm:$0xff]  }
  0x14   :  { %3162 = vmatpush3.bf16.msra.mxu0 %v3499_v18  ;;  %v3532_v9 = vld [vmem:[%s4686_s1 + $0x1b0] sm:$0xff]   ;;  %v3540_v17 = vld [vmem:[%s4686_s1 + $0x1a0] sm:$0xff]   ;;  %v3541_v18 = vld [vmem:[%s4686_s1 + $0x158] sm:$0xff]   ;;  %v170_v39 = vrot.slane %v3557_v34, %v3951_v43  ;;  %v184_v40 = vrot.slane %v3559_v35, %v3951_v43 }
  0x15   :  { %3184 = vmatpush3.bf16.msra.mxu1 %v3500_v19  ;;  %3163 = vmatprep.subr.bf16.mxu0 %v3501_v20  ;;  %v605_v2 = vpack.c.bf16 %v373_v57, %v157_v56  ;;  %v604_v3 = vpack.c.bf16 %v372_v59, %v156_v58  ;;  %v607_v5 = vpack.c.bf16 %v375_v62, %v159_v61  ;;  %v3542_v19 = vld [vmem:[%s4686_s1 + $0x1d8] sm:$0xff]   ;;  %v3556_v33 = vld [vmem:[%s4686_s1 + $0x180] sm:$0xff]  }
  0x16   :  { %3185 = vmatprep.subr.bf16.mxu1 %v3502_v21  ;;  %v606_v6 = vpack.c.bf16 %v374_v0, %v158_v63  ;;  %v3543_v20 = vld [vmem:[%s4686_s1 + $0x118] sm:$0xff]   ;;  %v193_v49 = vcombine.high %v170_v39, %v184_v40  ;;  %v192_v55 = vcombine.low %v170_v39, %v184_v40  ;;  %v3607_v34 = vld [vmem:[%s4685_s0 + $0x130] ss:$48 sps:$4 sm:$0xff]  }
  0x17   :  { %2203 = vmatprep.mubr.bf16.mxu0 %v605_v2  ;;  %2244 = vmatprep.mubr.bf16.mxu1 %v607_v5  ;;  %v3544_v21 = vld [vmem:[%s4686_s1 + $0x198] sm:$0xff]   ;;  %v3575_v5 = vld [vmem:[%s4686_s1 + $0x230] sm:$0xff]  }
  0x18   :  { %3164 = vmatpush3.bf16.msra.mxu0 %v3503_v22  ;;  %v3545_v22 = vld [vmem:[%s4686_s1 + $0x150] sm:$0xff]   ;;  %v3561_v36 = vld [vmem:[%s4685_s0 + $0xc8] ss:$48 sps:$4 sm:$0xff]   ;;  %v3565_v38 = vld [vmem:[%s4685_s0 + $0xc] ss:$48 sps:$4 sm:$0xff]  }
  0x19   :  { %3186 = vmatpush3.bf16.msra.mxu1 %v3504_v23  ;;  %3165 = vmatprep.subr.bf16.mxu0 %v3505_v24  ;;  %v3546_v23 = vld [vmem:[%s4686_s1 + $0x1d0] sm:$0xff]   ;;  %v3563_v37 = vld [vmem:[%s4685_s0 + $0x128] ss:$48 sps:$4 sm:$0xff]   ;;  %v3566_v41 = vld [vmem:[%s4685_s0 + $0x6c] ss:$48 sps:$4 sm:$0xff]   ;;  %v386_v45 = vrot.slane %v3561_v36, %v3951_v43  ;;  %v177_v47 = vrot.slane %v3565_v38, %v3951_v43 }
  0x1a   :  { %3187 = vmatprep.subr.bf16.mxu1 %v3506_v25  ;;  %v3547_v24 = vld [vmem:[%s4686_s1 + $0x110] sm:$0xff]   ;;  %v3567_v42 = vld [vmem:[%s4685_s0 + $0xcc] ss:$48 sps:$4 sm:$0xff]   ;;  %v191_v50 = vrot.slane %v3566_v41, %v3951_v43  ;;  %v436_v41 = vrot.slane %v3607_v34, %v3951_v43 }
  0x1b   :  { %v3548_v25 = vld [vmem:[%s4686_s1 + $0x190] sm:$0xff]   ;;  %v3568_v44 = vld [vmem:[%s4685_s0 + $0x12c] ss:$48 sps:$4 sm:$0xff]  }
  0x1c   :  { %3166 = vmatpush3.bf16.msra.mxu0 %v3507_v26  ;;  %v3549_v26 = vld [vmem:[%s4686_s1 + $0x148] sm:$0xff]   ;;  %v3569_v48 = vld [vmem:[%s4686_s1 + $0x278] sm:$0xff]   ;;  %v407_v52 = vrot.slane %v3568_v44, %v3951_v43  ;;  %v195_v58 = vcombine.high %v177_v47, %v191_v50  ;;  %v3609_v36 = vld [vmem:[%s4685_s0 + $0x14] ss:$48 sps:$4 sm:$0xff]  }
  0x1d   :  { %3188 = vmatpush3.bf16.msra.mxu1 %v3508_v27  ;;  %3167 = vmatprep.subr.bf16.mxu0 %v3509_v28  ;;  %v3550_v27 = vld [vmem:[%s4686_s1 + $0x1c8] sm:$0xff]   ;;  %v3570_v53 = vld [vmem:[%s4686_s1 + $0x2f8] sm:$0xff]   ;;  %v3611_v38 = vld [vmem:[%s4685_s0 + $0xd4] ss:$48 sps:$4 sm:$0xff]   ;;  %v213_v44 = vrot.slane %v3609_v36, %v3951_v43 }
  0x1e   :  { %3189 = vmatprep.subr.bf16.mxu1 %v3510_v30  ;;  %v3551_v28 = vld [vmem:[%s4686_s1 + $0x108] sm:$0xff]   ;;  %v3553_v30 = vld [vmem:[%s4686_s1 + $0x140] sm:$0xff]   ;;  %v3571_v57 = vld [vmem:[%s4686_s1 + $0x238] sm:$0xff]  }
  0x1f   :  { %v3572_v62 = vld [vmem:[%s4686_s1 + $0x2b8] sm:$0xff]  }
  0x20   :  { %3168 = vmatpush3.bf16.msra.mxu0 %v3511_v31  ;;  %v3554_v31 = vld [vmem:[%s4686_s1 + $0x1c0] sm:$0xff]  }
  0x21   :  { %3190 = vmatpush3.bf16.msra.mxu1 %v3512_v32  ;;  %3197 = vmatprep.subr.bf16.mxu0 %v3525_v46  ;;  %v3555_v32 = vld [vmem:[%s4686_s1 + $0x100] sm:$0xff]   ;;  %v400_v46 = vrot.slane %v3563_v37, %v3951_v43 }
  0x22   :  { %3219 = vmatprep.subr.bf16.mxu1 %v3526_v51  ;;  %v393_v51 = vrot.slane %v3567_v42, %v3951_v43  ;;  %v3610_v37 = vld [vmem:[%s4685_s0 + $0x74] ss:$48 sps:$4 sm:$0xff]  }
  0x23   :  { %2204 = vmatmul.mubr.bf16.vlgmr.msra.gmra.mxu0 %v604_v3  ;;  %v409_v54 = vcombine.high %v386_v45, %v400_v46  ;;  %v408_v56 = vcombine.low %v386_v45, %v400_v46  ;;  %v3612_v42 = vld [vmem:[%s4685_s0 + $0x134] ss:$48 sps:$4 sm:$0xff]   ;;  %v227_v45 = vrot.slane %v3610_v37, %v3951_v43  ;;  %v429_v46 = vrot.slane %v3611_v38, %v3951_v43  ;;  %v3655_v37 = vld [vmem:[%s4685_s0 + $0xdc] ss:$48 sps:$4 sm:$0xff]  }
  0x24   :  { %2245 = vmatmul.mubr.bf16.vlgmr.msra.gmra.mxu1 %v606_v6  ;;  %3198 = vmatpush3.bf16.msra.mxu0 %v3527_v60  ;;  %v411_v59 = vcombine.high %v393_v51, %v407_v52  ;;  %v194_v60 = vcombine.low %v177_v47, %v191_v50  ;;  %v410_v61 = vcombine.low %v393_v51, %v407_v52  ;;  %v3576_v6 = vld [vmem:[%s4686_s1 + $0x2b0] sm:$0xff]   ;;  %v3613_v47 = vld [vmem:[%s4686_s1 + $0x378] sm:$0xff]  }
  0x25   :  { %3220 = vmatpush3.bf16.msra.mxu1 %v3528_v1  ;;  %3199 = vmatprep.subr.bf16.mxu0 %v3529_v4  ;;  %v609_v63 = vpack.c.bf16 %v409_v54, %v193_v49  ;;  %v608_v0 = vpack.c.bf16 %v408_v56, %v192_v55  ;;  %v3573_v1 = vld [vmem:[%s4686_s1 + $0x270] sm:$0xff]   ;;  %v443_v50 = vrot.slane %v3612_v42, %v3951_v43  ;;  %v3614_v52 = vld [vmem:[%s4686_s1 + $0x3f8] sm:$0xff]  }
  0x26   :  { %3221 = vmatprep.subr.bf16.mxu1 %v3530_v7  ;;  %v611_v2 = vpack.c.bf16 %v411_v59, %v195_v58  ;;  %v610_v3 = vpack.c.bf16 %v410_v61, %v194_v60  ;;  %v3574_v4 = vld [vmem:[%s4686_s1 + $0x2f0] sm:$0xff]   ;;  %v3577_v7 = vld [vmem:[%s4686_s1 + $0x268] sm:$0xff]   ;;  %v230_v55 = vcombine.low %v213_v44, %v227_v45  ;;  %v3615_v56 = vld [vmem:[%s4686_s1 + $0x338] sm:$0xff]  }
  0x27   :  { %2285 = vmatprep.mubr.bf16.mxu0 %v609_v63  ;;  %v447_v58 = vcombine.high %v429_v46, %v443_v50  ;;  %v446_v59 = vcombine.low %v429_v46, %v443_v50  ;;  %v3616_v60 = vld [vmem:[%s4686_s1 + $0x3b8] sm:$0xff]  }
  0x28   :  { %3200 = vmatpush3.bf16.msra.mxu0 %v3531_v8  ;;  %2326 = vmatprep.mubr.bf16.mxu1 %v611_v2  ;;  %v3578_v8 = vld [vmem:[%s4686_s1 + $0x2e8] sm:$0xff]   ;;  %v3619_v2 = vld [vmem:[%s4686_s1 + $0x330] sm:$0xff]   ;;  %v3657_v42 = vld [vmem:[%s4686_s1 + $0x478] sm:$0xff]  }
  0x29   :  { %3222 = vmatpush3.bf16.msra.mxu1 %v3532_v9  ;;  %3201 = vmatprep.subr.bf16.mxu0 %v3533_v10  ;;  %v3579_v9 = vld [vmem:[%s4686_s1 + $0x228] sm:$0xff]  }
  0x2a   :  { %3223 = vmatprep.subr.bf16.mxu1 %v3534_v11  ;;  %v3580_v10 = vld [vmem:[%s4686_s1 + $0x2a8] sm:$0xff]   ;;  %v3581_v11 = vld [vmem:[%s4686_s1 + $0x260] sm:$0xff]  }
  0x2b   :  { %v3656_v38 = vld [vmem:[%s4685_s0 + $0x13c] ss:$48 sps:$4 sm:$0xff]  }
  0x2c   :  { %3202 = vmatpush3.bf16.msra.mxu0 %v3535_v12  ;;  %v3582_v12 = vld [vmem:[%s4686_s1 + $0x2e0] sm:$0xff]   ;;  %v479_v46 = vrot.slane %v3656_v38, %v3951_v43  ;;  %v3701_v38 = vld [vmem:[%s4686_s1 + $0x578] sm:$0xff]  }
  0x2d   :  { %3224 = vmatpush3.bf16.msra.mxu1 %v3536_v13  ;;  %3203 = vmatprep.subr.bf16.mxu0 %v3537_v14  ;;  %v3583_v13 = vld [vmem:[%s4686_s1 + $0x220] sm:$0xff]  }
  0x2e   :  { %3225 = vmatprep.subr.bf16.mxu1 %v3538_v15  ;;  %v3584_v14 = vld [vmem:[%s4686_s1 + $0x2a0] sm:$0xff]   ;;  %v3585_v15 = vld [vmem:[%s4686_s1 + $0x258] sm:$0xff]  }
  0x30   :  { %3204 = vmatpush3.bf16.msra.mxu0 %v3539_v16  ;;  %v3586_v16 = vld [vmem:[%s4686_s1 + $0x2d8] sm:$0xff]  }
  0x31   :  { %3226 = vmatpush3.bf16.msra.mxu1 %v3540_v17  ;;  %3205 = vmatprep.subr.bf16.mxu0 %v3541_v18  ;;  %v3587_v17 = vld [vmem:[%s4686_s1 + $0x218] sm:$0xff]  }
  0x32   :  { %3227 = vmatprep.subr.bf16.mxu1 %v3542_v19  ;;  %v3588_v18 = vld [vmem:[%s4686_s1 + $0x298] sm:$0xff]   ;;  %v3589_v19 = vld [vmem:[%s4686_s1 + $0x250] sm:$0xff]  }
  0x34   :  { %3206 = vmatpush3.bf16.msra.mxu0 %v3543_v20  ;;  %v3590_v20 = vld [vmem:[%s4686_s1 + $0x2d0] sm:$0xff]  }
  0x35   :  { %3228 = vmatpush3.bf16.msra.mxu1 %v3544_v21  ;;  %3207 = vmatprep.subr.bf16.mxu0 %v3545_v22  ;;  %v3591_v21 = vld [vmem:[%s4686_s1 + $0x210] sm:$0xff]  }
  0x36   :  { %3229 = vmatprep.subr.bf16.mxu1 %v3546_v23  ;;  %v3592_v22 = vld [vmem:[%s4686_s1 + $0x290] sm:$0xff]   ;;  %v3593_v23 = vld [vmem:[%s4686_s1 + $0x248] sm:$0xff]  }
  0x38   :  { %3208 = vmatpush3.bf16.msra.mxu0 %v3547_v24  ;;  %v3594_v24 = vld [vmem:[%s4686_s1 + $0x2c8] sm:$0xff]  }
  0x39   :  { %3230 = vmatpush3.bf16.msra.mxu1 %v3548_v25  ;;  %3209 = vmatprep.subr.bf16.mxu0 %v3549_v26  ;;  %v3595_v25 = vld [vmem:[%s4686_s1 + $0x208] sm:$0xff]  }
  0x3a   :  { %3231 = vmatprep.subr.bf16.mxu1 %v3550_v27  ;;  %v3596_v26 = vld [vmem:[%s4686_s1 + $0x288] sm:$0xff]   ;;  %v3597_v27 = vld [vmem:[%s4686_s1 + $0x240] sm:$0xff]  }
  0x3c   :  { %3210 = vmatpush3.bf16.msra.mxu0 %v3551_v28  ;;  %v3598_v28 = vld [vmem:[%s4686_s1 + $0x2c0] sm:$0xff]  }
  0x3d   :  { %3232 = vmatpush3.bf16.msra.mxu1 %v3552_v29  ;;  %3211 = vmatprep.subr.bf16.mxu0 %v3553_v30  ;;  %v3599_v29 = vld [vmem:[%s4686_s1 + $0x200] sm:$0xff]  }
  0x3e   :  { %3233 = vmatprep.subr.bf16.mxu1 %v3554_v31  ;;  %v3600_v30 = vld [vmem:[%s4686_s1 + $0x280] sm:$0xff]  }
  0x3f   :  { %v3601_v31 = vld [vmem:[%s4685_s0 + $0x10] ss:$48 sps:$4 sm:$0xff]  }
  0x40   :  { %3212 = vmatpush3.bf16.msra.mxu0 %v3555_v32  ;;  %v3603_v32 = vld [vmem:[%s4685_s0 + $0x70] ss:$48 sps:$4 sm:$0xff]   ;;  %v206_v35 = vrot.slane %v3601_v31, %v3951_v43  ;;  %v3651_v31 = vld [vmem:[%s4685_s0 + $0x138] ss:$48 sps:$4 sm:$0xff]  }
  0x41   :  { %3234 = vmatpush3.bf16.msra.mxu1 %v3556_v33  ;;  %3241 = vmatprep.subr.bf16.mxu0 %v3569_v48  ;;  %v3605_v33 = vld [vmem:[%s4685_s0 + $0xd0] ss:$48 sps:$4 sm:$0xff]   ;;  %v220_v39 = vrot.slane %v3603_v32, %v3951_v43  ;;  %v3653_v32 = vld [vmem:[%s4685_s0 + $0x1c] ss:$48 sps:$4 sm:$0xff]  }
  0x42   :  { %3263 = vmatprep.subr.bf16.mxu1 %v3570_v53  ;;  %v422_v40 = vrot.slane %v3605_v33, %v3951_v43  ;;  %v231_v53 = vcombine.high %v213_v44, %v227_v45  ;;  %v3654_v33 = vld [vmem:[%s4685_s0 + $0x7c] ss:$48 sps:$4 sm:$0xff]   ;;  %v465_v45 = vrot.slane %v3655_v37, %v3951_v43 }
  0x43   :  { %2286 = vmatmul.mubr.bf16.vlgmr.msra.gmra.mxu0 %v608_v0  ;;  %v229_v48 = vcombine.high %v206_v35, %v220_v39  ;;  %v228_v51 = vcombine.low %v206_v35, %v220_v39  ;;  %v614_v0 = vpack.c.bf16 %v446_v59, %v230_v55  ;;  %v472_v39 = vrot.slane %v3651_v31, %v3951_v43  ;;  %v3661_v59 = vld [vmem:[%s4686_s1 + $0x470] sm:$0xff]  }
  0x44   :  { %2327 = vmatmul.mubr.bf16.vlgmr.msra.gmra.mxu1 %v610_v3  ;;  %3242 = vmatpush3.bf16.msra.mxu0 %v3571_v57  ;;  %v445_v49 = vcombine.high %v422_v40, %v436_v41  ;;  %v444_v54 = vcombine.low %v422_v40, %v436_v41  ;;  %v615_v63 = vpack.c.bf16 %v447_v58, %v231_v53  ;;  %v3620_v3 = vld [vmem:[%s4686_s1 + $0x3b0] sm:$0xff]   ;;  %v3659_v53 = vld [vmem:[%s4686_s1 + $0x438] sm:$0xff]  }
  0x45   :  { %3264 = vmatpush3.bf16.msra.mxu1 %v3572_v62  ;;  %3243 = vmatprep.subr.bf16.mxu0 %v3573_v1  ;;  %v3617_v62 = vld [vmem:[%s4686_s1 + $0x370] sm:$0xff]   ;;  %v249_v40 = vrot.slane %v3653_v32, %v3951_v43  ;;  %v263_v41 = vrot.slane %v3654_v33, %v3951_v43  ;;  %v482_v55 = vcombine.low %v465_v45, %v479_v46 }
  0x46   :  { %3265 = vmatprep.subr.bf16.mxu1 %v3574_v4  ;;  %v613_v57 = vpack.c.bf16 %v445_v49, %v229_v48  ;;  %v612_v61 = vpack.c.bf16 %v444_v54, %v228_v51  ;;  %v3618_v1 = vld [vmem:[%s4686_s1 + $0x3f0] sm:$0xff]   ;;  %2408 = vmatprep.mubr.bf16.mxu1 %v615_v63  ;;  %v3621_v4 = vld [vmem:[%s4686_s1 + $0x368] sm:$0xff]   ;;  %v3658_v48 = vld [vmem:[%s4686_s1 + $0x4f8] sm:$0xff]   ;;  %v483_v54 = vcombine.high %v465_v45, %v479_v46 }
  0x47   :  { %v267_v50 = vcombine.high %v249_v40, %v263_v41  ;;  %v3663_v63 = vld [vmem:[%s4686_s1 + $0x430] sm:$0xff]  }
  0x48   :  { %3244 = vmatpush3.bf16.msra.mxu0 %v3575_v5  ;;  %2367 = vmatprep.mubr.bf16.mxu0 %v613_v57  ;;  %v3622_v5 = vld [vmem:[%s4686_s1 + $0x3e8] sm:$0xff]   ;;  %v3698_v32 = vld [vmem:[%s4685_s0 + $0x84] ss:$48 sps:$4 sm:$0xff]  }
  0x49   :  { %3266 = vmatpush3.bf16.msra.mxu1 %v3576_v6  ;;  %3245 = vmatprep.subr.bf16.mxu0 %v3577_v7  ;;  %v3623_v6 = vld [vmem:[%s4686_s1 + $0x328] sm:$0xff]   ;;  %v3699_v33 = vld [vmem:[%s4685_s0 + $0xe4] ss:$48 sps:$4 sm:$0xff]  }
  0x4a   :  { %3267 = vmatprep.subr.bf16.mxu1 %v3578_v8  ;;  %v3624_v7 = vld [vmem:[%s4686_s1 + $0x3a8] sm:$0xff]   ;;  %v3625_v8 = vld [vmem:[%s4686_s1 + $0x360] sm:$0xff]  }
  0x4c   :  { %3246 = vmatpush3.bf16.msra.mxu0 %v3579_v9  ;;  %v3626_v9 = vld [vmem:[%s4686_s1 + $0x3e0] sm:$0xff]  }
  0x4d   :  { %3268 = vmatpush3.bf16.msra.mxu1 %v3580_v10  ;;  %3247 = vmatprep.subr.bf16.mxu0 %v3581_v11  ;;  %v3627_v10 = vld [vmem:[%s4686_s1 + $0x320] sm:$0xff]  }
  0x4e   :  { %3269 = vmatprep.subr.bf16.mxu1 %v3582_v12  ;;  %v3628_v11 = vld [vmem:[%s4686_s1 + $0x3a0] sm:$0xff]   ;;  %v3629_v12 = vld [vmem:[%s4686_s1 + $0x358] sm:$0xff]  }
  0x50   :  { %3248 = vmatpush3.bf16.msra.mxu0 %v3583_v13  ;;  %v3630_v13 = vld [vmem:[%s4686_s1 + $0x3d8] sm:$0xff]  }
  0x51   :  { %3270 = vmatpush3.bf16.msra.mxu1 %v3584_v14  ;;  %3249 = vmatprep.subr.bf16.mxu0 %v3585_v15  ;;  %v3631_v14 = vld [vmem:[%s4686_s1 + $0x318] sm:$0xff]  }
  0x52   :  { %3271 = vmatprep.subr.bf16.mxu1 %v3586_v16  ;;  %v3632_v15 = vld [vmem:[%s4686_s1 + $0x398] sm:$0xff]   ;;  %v3633_v16 = vld [vmem:[%s4686_s1 + $0x350] sm:$0xff]  }
  0x54   :  { %3250 = vmatpush3.bf16.msra.mxu0 %v3587_v17  ;;  %v3634_v17 = vld [vmem:[%s4686_s1 + $0x3d0] sm:$0xff]  }
  0x55   :  { %3272 = vmatpush3.bf16.msra.mxu1 %v3588_v18  ;;  %3251 = vmatprep.subr.bf16.mxu0 %v3589_v19  ;;  %v3635_v18 = vld [vmem:[%s4686_s1 + $0x310] sm:$0xff]  }
  0x56   :  { %3273 = vmatprep.subr.bf16.mxu1 %v3590_v20  ;;  %v3636_v19 = vld [vmem:[%s4686_s1 + $0x390] sm:$0xff]   ;;  %v3637_v20 = vld [vmem:[%s4686_s1 + $0x348] sm:$0xff]  }
  0x58   :  { %3252 = vmatpush3.bf16.msra.mxu0 %v3591_v21  ;;  %v3638_v21 = vld [vmem:[%s4686_s1 + $0x3c8] sm:$0xff]  }
  0x59   :  { %3274 = vmatpush3.bf16.msra.mxu1 %v3592_v22  ;;  %3253 = vmatprep.subr.bf16.mxu0 %v3593_v23  ;;  %v3639_v22 = vld [vmem:[%s4686_s1 + $0x308] sm:$0xff]  }
  0x5a   :  { %3275 = vmatprep.subr.bf16.mxu1 %v3594_v24  ;;  %v3640_v23 = vld [vmem:[%s4686_s1 + $0x388] sm:$0xff]   ;;  %v3641_v24 = vld [vmem:[%s4686_s1 + $0x340] sm:$0xff]  }
  0x5c   :  { %3254 = vmatpush3.bf16.msra.mxu0 %v3595_v25  ;;  %v3642_v25 = vld [vmem:[%s4686_s1 + $0x3c0] sm:$0xff]  }
  0x5d   :  { %3276 = vmatpush3.bf16.msra.mxu1 %v3596_v26  ;;  %3255 = vmatprep.subr.bf16.mxu0 %v3597_v27  ;;  %v3643_v26 = vld [vmem:[%s4686_s1 + $0x300] sm:$0xff]  }
  0x5e   :  { %3277 = vmatprep.subr.bf16.mxu1 %v3598_v28  ;;  %v3644_v27 = vld [vmem:[%s4686_s1 + $0x380] sm:$0xff]   ;;  %v3645_v28 = vld [vmem:[%s4685_s0 + $0x18] ss:$48 sps:$4 sm:$0xff]  }
  0x5f   :  { %v242_v34 = vrot.slane %v3645_v28, %v3951_v43  ;;  %v3695_v28 = vld [vmem:[%s4685_s0 + $0x140] ss:$48 sps:$4 sm:$0xff]  }
  0x60   :  { %3256 = vmatpush3.bf16.msra.mxu0 %v3599_v29  ;;  %v3647_v29 = vld [vmem:[%s4685_s0 + $0x78] ss:$48 sps:$4 sm:$0xff]  }
  0x61   :  { %3278 = vmatpush3.bf16.msra.mxu1 %v3600_v30  ;;  %3285 = vmatprep.subr.bf16.mxu0 %v3613_v47  ;;  %v3649_v30 = vld [vmem:[%s4685_s0 + $0xd8] ss:$48 sps:$4 sm:$0xff]   ;;  %v256_v35 = vrot.slane %v3647_v29, %v3951_v43  ;;  %v3697_v29 = vld [vmem:[%s4685_s0 + $0x24] ss:$48 sps:$4 sm:$0xff]  }
  0x62   :  { %3307 = vmatprep.subr.bf16.mxu1 %v3614_v52  ;;  %v458_v36 = vrot.slane %v3649_v30, %v3951_v43  ;;  %v266_v52 = vcombine.low %v249_v40, %v263_v41  ;;  %v285_v37 = vrot.slane %v3697_v29, %v3951_v43  ;;  %v299_v40 = vrot.slane %v3698_v32, %v3951_v43  ;;  %v3743_v29 = vld [vmem:[%s4685_s0 + $0xec] ss:$48 sps:$4 sm:$0xff]  }
  0x63   :  { %2368 = vmatmul.mubr.bf16.vlgmr.msra.gmra.mxu0 %v612_v61  ;;  %v265_v44 = vcombine.high %v242_v34, %v256_v35  ;;  %v264_v47 = vcombine.low %v242_v34, %v256_v35  ;;  %v3700_v34 = vld [vmem:[%s4685_s0 + $0x144] ss:$48 sps:$4 sm:$0xff]   ;;  %v501_v41 = vrot.slane %v3699_v33, %v3951_v43  ;;  %v3744_v33 = vld [vmem:[%s4685_s0 + $0x14c] ss:$48 sps:$4 sm:$0xff]  }
  0x64   :  { %3286 = vmatpush3.bf16.msra.mxu0 %v3615_v56  ;;  %2409 = vmatmul.mubr.bf16.vlgmr.msra.gmra.mxu1 %v614_v0  ;;  %v481_v49 = vcombine.high %v458_v36, %v472_v39  ;;  %v480_v51 = vcombine.low %v458_v36, %v472_v39  ;;  %v3660_v56 = vld [vmem:[%s4686_s1 + $0x4b8] sm:$0xff]   ;;  %v618_v61 = vpack.c.bf16 %v482_v55, %v266_v52  ;;  %v3664_v0 = vld [vmem:[%s4686_s1 + $0x4b0] sm:$0xff]  }
  0x65   :  { %3287 = vmatprep.subr.bf16.mxu0 %v3617_v62  ;;  %3308 = vmatpush3.bf16.msra.mxu1 %v3616_v60  ;;  %v619_v60 = vpack.c.bf16 %v483_v54, %v267_v50  ;;  %v3662_v62 = vld [vmem:[%s4686_s1 + $0x4f0] sm:$0xff]   ;;  %v508_v36 = vrot.slane %v3695_v28, %v3951_v43  ;;  %v3742_v28 = vld [vmem:[%s4685_s0 + $0x8c] ss:$48 sps:$4 sm:$0xff]  }
  0x66   :  { %3309 = vmatprep.subr.bf16.mxu1 %v3618_v1  ;;  %v617_v57 = vpack.c.bf16 %v481_v49, %v265_v44  ;;  %v616_v58 = vpack.c.bf16 %v480_v51, %v264_v47  ;;  %v3665_v1 = vld [vmem:[%s4686_s1 + $0x468] sm:$0xff]   ;;  %v3702_v44 = vld [vmem:[%s4686_s1 + $0x5f8] sm:$0xff]   ;;  %v303_v49 = vcombine.high %v285_v37, %v299_v40  ;;  %v302_v51 = vcombine.low %v285_v37, %v299_v40 }
  0x67   :  { %2490 = vmatprep.mubr.bf16.mxu1 %v619_v60  ;;  %v3707_v60 = vld [vmem:[%s4686_s1 + $0x530] sm:$0xff]  }
  0x68   :  { %3288 = vmatpush3.bf16.msra.mxu0 %v3619_v2  ;;  %2449 = vmatprep.mubr.bf16.mxu0 %v617_v57  ;;  %v3666_v2 = vld [vmem:[%s4686_s1 + $0x4e8] sm:$0xff]  }
  0x69   :  { %3289 = vmatprep.subr.bf16.mxu0 %v3621_v4  ;;  %3310 = vmatpush3.bf16.msra.mxu1 %v3620_v3  ;;  %v3667_v3 = vld [vmem:[%s4686_s1 + $0x428] sm:$0xff]  }
  0x6a   :  { %3311 = vmatprep.subr.bf16.mxu1 %v3622_v5  ;;  %v3668_v4 = vld [vmem:[%s4686_s1 + $0x4a8] sm:$0xff]   ;;  %v3669_v5 = vld [vmem:[%s4686_s1 + $0x460] sm:$0xff]  }
  0x6c   :  { %3290 = vmatpush3.bf16.msra.mxu0 %v3623_v6  ;;  %v3670_v6 = vld [vmem:[%s4686_s1 + $0x4e0] sm:$0xff]  }
  0x6d   :  { %3291 = vmatprep.subr.bf16.mxu0 %v3625_v8  ;;  %3312 = vmatpush3.bf16.msra.mxu1 %v3624_v7  ;;  %v3671_v7 = vld [vmem:[%s4686_s1 + $0x420] sm:$0xff]  }
  0x6e   :  { %3313 = vmatprep.subr.bf16.mxu1 %v3626_v9  ;;  %v3672_v8 = vld [vmem:[%s4686_s1 + $0x4a0] sm:$0xff]   ;;  %v3673_v9 = vld [vmem:[%s4686_s1 + $0x458] sm:$0xff]  }
  0x70   :  { %3292 = vmatpush3.bf16.msra.mxu0 %v3627_v10  ;;  %v3674_v10 = vld [vmem:[%s4686_s1 + $0x4d8] sm:$0xff]  }
  0x71   :  { %3293 = vmatprep.subr.bf16.mxu0 %v3629_v12  ;;  %3314 = vmatpush3.bf16.msra.mxu1 %v3628_v11  ;;  %v3675_v11 = vld [vmem:[%s4686_s1 + $0x418] sm:$0xff]  }
  0x72   :  { %3315 = vmatprep.subr.bf16.mxu1 %v3630_v13  ;;  %v3676_v12 = vld [vmem:[%s4686_s1 + $0x498] sm:$0xff]   ;;  %v3677_v13 = vld [vmem:[%s4686_s1 + $0x450] sm:$0xff]  }
  0x74   :  { %3294 = vmatpush3.bf16.msra.mxu0 %v3631_v14  ;;  %v3678_v14 = vld [vmem:[%s4686_s1 + $0x4d0] sm:$0xff]  }
  0x75   :  { %3295 = vmatprep.subr.bf16.mxu0 %v3633_v16  ;;  %3316 = vmatpush3.bf16.msra.mxu1 %v3632_v15  ;;  %v3679_v15 = vld [vmem:[%s4686_s1 + $0x410] sm:$0xff]  }
  0x76   :  { %3317 = vmatprep.subr.bf16.mxu1 %v3634_v17  ;;  %v3680_v16 = vld [vmem:[%s4686_s1 + $0x490] sm:$0xff]   ;;  %v3681_v17 = vld [vmem:[%s4686_s1 + $0x448] sm:$0xff]  }
  0x78   :  { %3296 = vmatpush3.bf16.msra.mxu0 %v3635_v18  ;;  %v3682_v18 = vld [vmem:[%s4686_s1 + $0x4c8] sm:$0xff]  }
  0x79   :  { %3297 = vmatprep.subr.bf16.mxu0 %v3637_v20  ;;  %3318 = vmatpush3.bf16.msra.mxu1 %v3636_v19  ;;  %v3683_v19 = vld [vmem:[%s4686_s1 + $0x408] sm:$0xff]  }
  0x7a   :  { %3319 = vmatprep.subr.bf16.mxu1 %v3638_v21  ;;  %v3684_v20 = vld [vmem:[%s4686_s1 + $0x488] sm:$0xff]   ;;  %v3685_v21 = vld [vmem:[%s4686_s1 + $0x440] sm:$0xff]  }
  0x7c   :  { %3298 = vmatpush3.bf16.msra.mxu0 %v3639_v22  ;;  %v3686_v22 = vld [vmem:[%s4686_s1 + $0x4c0] sm:$0xff]  }
  0x7d   :  { %3299 = vmatprep.subr.bf16.mxu0 %v3641_v24  ;;  %3320 = vmatpush3.bf16.msra.mxu1 %v3640_v23  ;;  %v3687_v23 = vld [vmem:[%s4686_s1 + $0x400] sm:$0xff]  }
  0x7e   :  { %3321 = vmatprep.subr.bf16.mxu1 %v3642_v25  ;;  %v3688_v24 = vld [vmem:[%s4686_s1 + $0x480] sm:$0xff]  }
  0x7f   :  { %v3689_v25 = vld [vmem:[%s4685_s0 + $0x20] ss:$48 sps:$4 sm:$0xff]  }
  0x80   :  { %3300 = vmatpush3.bf16.msra.mxu0 %v3643_v26  ;;  %v3691_v26 = vld [vmem:[%s4685_s0 + $0x80] ss:$48 sps:$4 sm:$0xff]   ;;  %v278_v30 = vrot.slane %v3689_v25, %v3951_v43  ;;  %v3739_v25 = vld [vmem:[%s4685_s0 + $0x148] ss:$48 sps:$4 sm:$0xff]  }
  0x81   :  { %3322 = vmatpush3.bf16.msra.mxu1 %v3644_v27  ;;  %3329 = vmatprep.subr.bf16.mxu0 %v3657_v42  ;;  %v3693_v27 = vld [vmem:[%s4685_s0 + $0xe0] ss:$48 sps:$4 sm:$0xff]   ;;  %v292_v31 = vrot.slane %v3691_v26, %v3951_v43  ;;  %v515_v42 = vrot.slane %v3700_v34, %v3951_v43  ;;  %v544_v32 = vrot.slane %v3739_v25, %v3951_v43 }
  0x82   :  { %3351 = vmatprep.subr.bf16.mxu1 %v3658_v48  ;;  %v494_v35 = vrot.slane %v3693_v27, %v3951_v43  ;;  %v3703_v48 = vld [vmem:[%s4686_s1 + $0x538] sm:$0xff]   ;;  %v2942_v25 = vld [vmem:[%s4687_s2] ss:$0 sm:$0xff] }
  0x83   :  { %2450 = vmatmul.mubr.bf16.vlgmr.msra.gmra.mxu0 %v616_v58  ;;  %v301_v39 = vcombine.high %v278_v30, %v292_v31  ;;  %v300_v46 = vcombine.low %v278_v30, %v292_v31  ;;  %v519_v50 = vcombine.high %v501_v41, %v515_v42  ;;  %v518_v52 = vcombine.low %v501_v41, %v515_v42  ;;  %v3741_v27 = vld [vmem:[%s4685_s0 + $0x2c] ss:$48 sps:$4 sm:$0xff]  }
  0x84   :  { %2491 = vmatmul.mubr.bf16.vlgmr.msra.gmra.mxu1 %v618_v61  ;;  %3330 = vmatpush3.bf16.msra.mxu0 %v3659_v53  ;;  %v517_v45 = vcombine.high %v494_v35, %v508_v36  ;;  %v516_v47 = vcombine.low %v494_v35, %v508_v36  ;;  %v3704_v53 = vld [vmem:[%s4686_s1 + $0x5b8] sm:$0xff]   ;;  %v3708_v61 = vld [vmem:[%s4686_s1 + $0x5b0] sm:$0xff]   ;;  %v321_v34 = vrot.slane %v3741_v27, %v3951_v43 }
  0x85   :  { %3352 = vmatpush3.bf16.msra.mxu1 %v3660_v56  ;;  %3331 = vmatprep.subr.bf16.mxu0 %v3661_v59  ;;  %v3705_v56 = vld [vmem:[%s4686_s1 + $0x570] sm:$0xff]   ;;  %v623_v57 = vpack.c.bf16 %v519_v50, %v303_v49  ;;  %v622_v58 = vpack.c.bf16 %v518_v52, %v302_v51  ;;  %v335_v35 = vrot.slane %v3742_v28, %v3951_v43  ;;  %v3745_v51 = vld [vmem:[%s4688_s3 + $0x38] sm:$0xff]   ;;  %v3792_v52 = vmov 0.0  }
  0x86   :  { %3353 = vmatprep.subr.bf16.mxu1 %v3662_v62  ;;  %v621_v54 = vpack.c.bf16 %v517_v45, %v301_v39  ;;  %v620_v55 = vpack.c.bf16 %v516_v47, %v300_v46  ;;  %v3706_v59 = vld [vmem:[%s4686_s1 + $0x5f0] sm:$0xff]   ;;  %v3709_v62 = vld [vmem:[%s4686_s1 + $0x568] sm:$0xff]   ;;  %v537_v36 = vrot.slane %v3743_v29, %v3951_v43  ;;  %v551_v39 = vrot.slane %v3744_v33, %v3951_v43 }
  0x87   :  { %2572 = vmatprep.mubr.bf16.mxu1 %v623_v57  ;;  %v339_v41 = vcombine.high %v321_v34, %v335_v35  ;;  %v3751_v57 = vld [vmem:[%s4688_s3 + $0x8] sm:$0xff]  }
  0x88   :  { %3332 = vmatpush3.bf16.msra.mxu0 %v3663_v63  ;;  %2531 = vmatprep.mubr.bf16.mxu0 %v621_v54  ;;  %v3710_v63 = vld [vmem:[%s4686_s1 + $0x5e8] sm:$0xff]   ;;  %v555_v46 = vcombine.high %v537_v36, %v551_v39  ;;  %v554_v47 = vcombine.low %v537_v36, %v551_v39  ;;  %v3748_v54 = vld [vmem:[%s4688_s3 + $0x20] sm:$0xff]  }
  0x89   :  { %3354 = vmatpush3.bf16.msra.mxu1 %v3664_v0  ;;  %3333 = vmatprep.subr.bf16.mxu0 %v3665_v1  ;;  %v3711_v0 = vld [vmem:[%s4686_s1 + $0x528] sm:$0xff]  }
  0x8a   :  { %3355 = vmatprep.subr.bf16.mxu1 %v3666_v2  ;;  %v3712_v1 = vld [vmem:[%s4686_s1 + $0x5a8] sm:$0xff]   ;;  %v3713_v2 = vld [vmem:[%s4686_s1 + $0x560] sm:$0xff]   ;;  %v627_v49 = vpack.c.bf16 %v555_v46, %v339_v41 }
  0x8c   :  { %3334 = vmatpush3.bf16.msra.mxu0 %v3667_v3  ;;  %v3714_v3 = vld [vmem:[%s4686_s1 + $0x5e0] sm:$0xff]  }
  0x8d   :  { %3356 = vmatpush3.bf16.msra.mxu1 %v3668_v4  ;;  %3335 = vmatprep.subr.bf16.mxu0 %v3669_v5  ;;  %v3715_v4 = vld [vmem:[%s4686_s1 + $0x520] sm:$0xff]  }
  0x8e   :  { %3357 = vmatprep.subr.bf16.mxu1 %v3670_v6  ;;  %v3716_v5 = vld [vmem:[%s4686_s1 + $0x5a0] sm:$0xff]   ;;  %v3717_v6 = vld [vmem:[%s4686_s1 + $0x558] sm:$0xff]  }
  0x90   :  { %3336 = vmatpush3.bf16.msra.mxu0 %v3671_v7  ;;  %v3718_v7 = vld [vmem:[%s4686_s1 + $0x5d8] sm:$0xff]  }
  0x91   :  { %3358 = vmatpush3.bf16.msra.mxu1 %v3672_v8  ;;  %3337 = vmatprep.subr.bf16.mxu0 %v3673_v9  ;;  %v3719_v8 = vld [vmem:[%s4686_s1 + $0x518] sm:$0xff]  }
  0x92   :  { %3359 = vmatprep.subr.bf16.mxu1 %v3674_v10  ;;  %v3720_v9 = vld [vmem:[%s4686_s1 + $0x598] sm:$0xff]   ;;  %v3721_v10 = vld [vmem:[%s4686_s1 + $0x550] sm:$0xff]  }
  0x94   :  { %3338 = vmatpush3.bf16.msra.mxu0 %v3675_v11  ;;  %v3722_v11 = vld [vmem:[%s4686_s1 + $0x5d0] sm:$0xff]  }
  0x95   :  { %3360 = vmatpush3.bf16.msra.mxu1 %v3676_v12  ;;  %3339 = vmatprep.subr.bf16.mxu0 %v3677_v13  ;;  %v3723_v12 = vld [vmem:[%s4686_s1 + $0x510] sm:$0xff]  }
  0x96   :  { %3361 = vmatprep.subr.bf16.mxu1 %v3678_v14  ;;  %v3724_v13 = vld [vmem:[%s4686_s1 + $0x590] sm:$0xff]   ;;  %v3725_v14 = vld [vmem:[%s4686_s1 + $0x548] sm:$0xff]  }
  0x98   :  { %3340 = vmatpush3.bf16.msra.mxu0 %v3679_v15  ;;  %v3726_v15 = vld [vmem:[%s4686_s1 + $0x5c8] sm:$0xff]  }
  0x99   :  { %3362 = vmatpush3.bf16.msra.mxu1 %v3680_v16  ;;  %3341 = vmatprep.subr.bf16.mxu0 %v3681_v17  ;;  %v3727_v16 = vld [vmem:[%s4686_s1 + $0x508] sm:$0xff]  }
  0x9a   :  { %3363 = vmatprep.subr.bf16.mxu1 %v3682_v18  ;;  %v3728_v17 = vld [vmem:[%s4686_s1 + $0x588] sm:$0xff]   ;;  %v3729_v18 = vld [vmem:[%s4686_s1 + $0x540] sm:$0xff]  }
  0x9c   :  { %3342 = vmatpush3.bf16.msra.mxu0 %v3683_v19  ;;  %v3730_v19 = vld [vmem:[%s4686_s1 + $0x5c0] sm:$0xff]  }
  0x9d   :  { %3364 = vmatpush3.bf16.msra.mxu1 %v3684_v20  ;;  %3343 = vmatprep.subr.bf16.mxu0 %v3685_v21  ;;  %v3731_v20 = vld [vmem:[%s4686_s1 + $0x500] sm:$0xff]  }
  0x9e   :  { %3365 = vmatprep.subr.bf16.mxu1 %v3686_v22  ;;  %v3732_v21 = vld [vmem:[%s4686_s1 + $0x580] sm:$0xff]   ;;  %v3733_v22 = vld [vmem:[%s4685_s0 + $0x28] ss:$48 sps:$4 sm:$0xff]  }
  0x9f   :  { %v314_v26 = vrot.slane %v3733_v22, %v3951_v43 }
  0xa0   :  { %3344 = vmatpush3.bf16.msra.mxu0 %v3687_v23  ;;  %v3735_v23 = vld [vmem:[%s4685_s0 + $0x88] ss:$48 sps:$4 sm:$0xff]  }
  0xa1   :  { %3366 = vmatpush3.bf16.msra.mxu1 %v3688_v24  ;;  %3373 = vmatprep.subr.bf16.mxu0 %v3701_v38  ;;  %v3737_v24 = vld [vmem:[%s4685_s0 + $0xe8] ss:$48 sps:$4 sm:$0xff]   ;;  %v328_v30 = vrot.slane %v3735_v23, %v3951_v43 }
  0xa2   :  { %3395 = vmatprep.subr.bf16.mxu1 %v3702_v44  ;;  %v530_v31 = vrot.slane %v3737_v24, %v3951_v43  ;;  %v338_v44 = vcombine.low %v321_v34, %v335_v35  ;;  %v3746_v43 = vld [vmem:[%s4688_s3 + $0x30] sm:$0xff]  }
  0xa3   :  { %2532 = vmatmul.mubr.bf16.vlgmr.msra.gmra.mxu0 %v620_v55  ;;  %v337_v37 = vcombine.high %v314_v26, %v328_v30  ;;  %v336_v40 = vcombine.low %v314_v26, %v328_v30  ;;  %v3749_v55 = vld [vmem:[%s4688_s3 + $0x18] sm:$0xff]  }
  0xa4   :  { %2573 = vmatmul.mubr.bf16.vlgmr.msra.gmra.mxu1 %v622_v58  ;;  %3374 = vmatpush3.bf16.msra.mxu0 %v3703_v48  ;;  %v553_v38 = vcombine.high %v530_v31, %v544_v32  ;;  %v552_v42 = vcombine.low %v530_v31, %v544_v32  ;;  %v626_v50 = vpack.c.bf16 %v554_v47, %v338_v44  ;;  %v3752_v58 = vld [vmem:[%s4688_s3] sm:$0xff]  }
  0xa5   :  { %3396 = vmatpush3.bf16.msra.mxu1 %v3704_v53  ;;  %3375 = vmatprep.subr.bf16.mxu0 %v3705_v56  ;;  %v3747_v53 = vld [vmem:[%s4688_s3 + $0x28] sm:$0xff]   ;;  %v3750_v56 = vld [vmem:[%s4688_s3 + $0x10] sm:$0xff]  }
  0xa6   :  { %3397 = vmatprep.subr.bf16.mxu1 %v3706_v59  ;;  %v625_v45 = vpack.c.bf16 %v553_v38, %v337_v37  ;;  %v624_v48 = vpack.c.bf16 %v552_v42, %v336_v40  ;;  %2654 = vmatprep.mubr.bf16.mxu1 %v627_v49  ;;  %v3753_v59 = vld [vmem:[%s4690_s5 + $0x38] sm:$0xff]  }
  0xa8   :  { %3376 = vmatpush3.bf16.msra.mxu0 %v3707_v60  ;;  %2613 = vmatprep.mubr.bf16.mxu0 %v625_v45  ;;  %v3754_v60 = vld [vmem:[%s4690_s5 + $0x30] sm:$0xff]  }
  0xa9   :  { %3398 = vmatpush3.bf16.msra.mxu1 %v3708_v61  ;;  %3377 = vmatprep.subr.bf16.mxu0 %v3709_v62  ;;  %v3755_v61 = vld [vmem:[%s4690_s5 + $0x28] sm:$0xff]   ;;  %v3756_v62 = vld [vmem:[%s4690_s5 + $0x20] sm:$0xff]  }
  0xaa   :  { %3399 = vmatprep.subr.bf16.mxu1 %v3710_v63  ;;  %v3757_v63 = vld [vmem:[%s4690_s5 + $0x18] sm:$0xff]  }
  0xac   :  { %3378 = vmatpush3.bf16.msra.mxu0 %v3711_v0 }
  0xad   :  { %3400 = vmatpush3.bf16.msra.mxu1 %v3712_v1  ;;  %3379 = vmatprep.subr.bf16.mxu0 %v3713_v2 }
  0xae   :  { %3401 = vmatprep.subr.bf16.mxu1 %v3714_v3 }
  0xb0   :  { %3380 = vmatpush3.bf16.msra.mxu0 %v3715_v4 }
  0xb1   :  { %3402 = vmatpush3.bf16.msra.mxu1 %v3716_v5  ;;  %3381 = vmatprep.subr.bf16.mxu0 %v3717_v6 }
  0xb2   :  { %3403 = vmatprep.subr.bf16.mxu1 %v3718_v7 }
  0xb4   :  { %3382 = vmatpush3.bf16.msra.mxu0 %v3719_v8 }
  0xb5   :  { %3404 = vmatpush3.bf16.msra.mxu1 %v3720_v9  ;;  %3383 = vmatprep.subr.bf16.mxu0 %v3721_v10 }
  0xb6   :  { %3405 = vmatprep.subr.bf16.mxu1 %v3722_v11 }
  0xb8   :  { %3384 = vmatpush3.bf16.msra.mxu0 %v3723_v12 }
  0xb9   :  { %3406 = vmatpush3.bf16.msra.mxu1 %v3724_v13  ;;  %3385 = vmatprep.subr.bf16.mxu0 %v3725_v14 }
  0xba   :  { %3407 = vmatprep.subr.bf16.mxu1 %v3726_v15 }
  0xbc   :  { %3386 = vmatpush3.bf16.msra.mxu0 %v3727_v16 }
  0xbd   :  { %3408 = vmatpush3.bf16.msra.mxu1 %v3728_v17  ;;  %3387 = vmatprep.subr.bf16.mxu0 %v3729_v18 }
  0xbe   :  { %3409 = vmatprep.subr.bf16.mxu1 %v3730_v19 }
  0xc0   :  { %3388 = vmatpush3.bf16.msra.mxu0 %v3731_v20 }
  0xc1   :  { %3410 = vmatpush3.bf16.msra.mxu1 %v3732_v21  ;;  %3435 = vmatprep.subr.bf16.mxu0 %v3792_v52 }
  0xc2   :  { %3455 = vmatprep.subr.bf16.mxu1 %v3792_v52 }
  0xc3   :  { %2614 = vmatmul.mubr.bf16.vlgmr.msra.gmra.mxu0 %v624_v48 }
  0xc4   :  { %2655 = vmatmul.mubr.bf16.vlgmr.msra.gmra.mxu1 %v626_v50  ;;  %3436 = vmatpush3.bf16.msra.mxu0 %v3745_v51 }
  0xc5   :  { %3437 = vmatprep.subr.bf16.mxu0 %v3792_v52  ;;  %3451 = vmatprep.mubr.msk.bf16.mxu0 %vm3793_vm0, %v3792_v52 }
  0xc6   :  { %3471 = vmatprep.mubr.msk.bf16.mxu1 %vm3793_vm0, %v3792_v52  ;;  %3456 = vmatpush3.bf16.msra.mxu1 %v3753_v59 }
  0xc7   :  { %3457 = vmatprep.subr.bf16.mxu1 %v3792_v52 }
  0xc8   :  { %3438 = vmatpush3.bf16.msra.mxu0 %v3746_v43 }
  0xc9   :  { %3439 = vmatprep.subr.bf16.mxu0 %v3792_v52 }
  0xca   :  { %3458 = vmatpush3.bf16.msra.mxu1 %v3754_v60 }
  0xcb   :  { %3459 = vmatprep.subr.bf16.mxu1 %v3792_v52 }
  0xcc   :  { %3440 = vmatpush3.bf16.msra.mxu0 %v3747_v53 }
  0xcd   :  { %3441 = vmatprep.subr.bf16.mxu0 %v3792_v52 }
  0xce   :  { %3460 = vmatpush3.bf16.msra.mxu1 %v3755_v61 }
  0xcf   :  { %3461 = vmatprep.subr.bf16.mxu1 %v3792_v52 }
  0xd0   :  { %3442 = vmatpush3.bf16.msra.mxu0 %v3748_v54 }
  0xd1   :  { %3443 = vmatprep.subr.bf16.mxu0 %v3792_v52 }
  0xd2   :  { %3462 = vmatpush3.bf16.msra.mxu1 %v3756_v62 }
  0xd3   :  { %3463 = vmatprep.subr.bf16.mxu1 %v3792_v52 }
  0xd4   :  { %3444 = vmatpush3.bf16.msra.mxu0 %v3749_v55 }
  0xd5   :  { %3445 = vmatprep.subr.bf16.mxu0 %v3792_v52 }
  0xd6   :  { %3464 = vmatpush3.bf16.msra.mxu1 %v3757_v63 }
  0xd7   :  { %3465 = vmatprep.subr.bf16.mxu1 %v3792_v52 }
  0xd8   :  { %3446 = vmatpush3.bf16.msra.mxu0 %v3750_v56 }
  0xd9   :  { %3447 = vmatprep.subr.bf16.mxu0 %v3792_v52 }
  0xdc   :  { %3448 = vmatpush3.bf16.msra.mxu0 %v3751_v57 }
  0xdd   :  { %3449 = vmatprep.subr.bf16.mxu0 %v3792_v52 }
  0xe0   :  { %3450 = vmatpush3.bf16.msra.mxu0 %v3752_v58 }
  0xe3   :  { %v3169_v0 = vpop.f32.mrf.mxu0 }
  0xe4   :  { %v3191_v1 = vpop.f32.mrf.mxu1 }
  0xe5   :  { %v3170_v2 = vpop.f32.mrf.mxu0 }
  0xe6   :  { %v3192_v3 = vpop.f32.mrf.mxu1  ;;  %v3171_v24 = vadd.f32 %v3170_v2, %v3169_v0 }
  0xe7   :  { %v3172_v4 = vpop.f32.mrf.mxu0  ;;  %v3193_v30 = vadd.f32 %v3192_v3, %v3191_v1 }
  0xe8   :  { %v3194_v5 = vpop.f32.mrf.mxu1  ;;  %v2206_v29 = vadd.f32 %v3171_v24, %v2942_v25 }
  0xe9   :  { %v3173_v6 = vpop.f32.mrf.mxu0 }
  0xea   :  { %v3195_v8 = vpop.f32.mrf.mxu1  ;;  %v3174_v31 = vadd.f32 %v3173_v6, %v3172_v4  ;;  %v2247_v35 = vadd.f32 %v3193_v30, %v2206_v29 }
  0xeb   :  { %v3196_v37 = vadd.f32 %v3195_v8, %v3194_v5 }
  0xec   :  { %v2209_v36 = vadd.f32 %v3174_v31, %v2942_v25 }
  0xee   :  { %v2250_v44 = vadd.f32 %v3196_v37, %v2209_v36  ;;  %v3758_v37 = vld [vmem:[%s4690_s5 + $0x10] sm:$0xff]  }
  0xef   :  { %3466 = vmatpush3.bf16.msra.mxu1 %v3758_v37 }
  0xf0   :  { %3467 = vmatprep.subr.bf16.mxu1 %v3792_v52 }
 0x103   :  { %v3213_v7 = vpop.f32.mrf.mxu0 }
 0x104   :  { %v3235_v9 = vpop.f32.mrf.mxu1 }
 0x105   :  { %v3214_v10 = vpop.f32.mrf.mxu0 }
 0x106   :  { %v3236_v11 = vpop.f32.mrf.mxu1  ;;  %v3215_v32 = vadd.f32 %v3214_v10, %v3213_v7 }
 0x107   :  { %v3216_v12 = vpop.f32.mrf.mxu0  ;;  %v3237_v39 = vadd.f32 %v3236_v11, %v3235_v9 }
 0x108   :  { %v3238_v13 = vpop.f32.mrf.mxu1  ;;  %v2288_v38 = vadd.f32 %v3215_v32, %v2247_v35 }
 0x109   :  { %v3217_v14 = vpop.f32.mrf.mxu0 }
 0x10a   :  { %v3239_v16 = vpop.f32.mrf.mxu1  ;;  %v3218_v40 = vadd.f32 %v3217_v14, %v3216_v12  ;;  %v2329_v47 = vadd.f32 %v3237_v39, %v2288_v38  ;;  %v3759_v38 = vld [vmem:[%s4690_s5 + $0x8] sm:$0xff]   ;;  %v3760_v39 = vld [vmem:[%s4690_s5] sm:$0xff]  }
 0x10b   :  { %v3240_v50 = vadd.f32 %v3239_v16, %v3238_v13  ;;  %3468 = vmatpush3.bf16.msra.mxu1 %v3759_v38 }
 0x10c   :  { %v2291_v48 = vadd.f32 %v3218_v40, %v2250_v44  ;;  %3469 = vmatprep.subr.bf16.mxu1 %v3792_v52  ;;  %v3135_v40 = vld [vmem:[%s4689_s4] ss:$0 sm:$0xff] }
 0x10d   :  { %v3144_v52 = vld [vmem:[%s4691_s6] ss:$0 sm:$0xff] }
 0x10e   :  { %v2332_v56 = vadd.f32 %v3240_v50, %v2291_v48 }
 0x10f   :  { %3470 = vmatpush3.bf16.msra.mxu1 %v3760_v39 }
 0x123   :  { %v3257_v15 = vpop.f32.mrf.mxu0 }
 0x124   :  { %v3279_v17 = vpop.f32.mrf.mxu1 }
 0x125   :  { %v3258_v18 = vpop.f32.mrf.mxu0 }
 0x126   :  { %v3280_v19 = vpop.f32.mrf.mxu1  ;;  %v3259_v45 = vadd.f32 %v3258_v18, %v3257_v15 }
 0x127   :  { %v3260_v20 = vpop.f32.mrf.mxu0  ;;  %v3281_v43 = vadd.f32 %v3280_v19, %v3279_v17 }
 0x128   :  { %v3282_v21 = vpop.f32.mrf.mxu1  ;;  %v2370_v51 = vadd.f32 %v3259_v45, %v2329_v47 }
 0x129   :  { %v3261_v22 = vpop.f32.mrf.mxu0 }
 0x12a   :  { %v3283_v26 = vpop.f32.mrf.mxu1  ;;  %v3262_v53 = vadd.f32 %v3261_v22, %v3260_v20  ;;  %v2411_v58 = vadd.f32 %v3281_v43, %v2370_v51 }
 0x12b   :  { %v3284_v62 = vadd.f32 %v3283_v26, %v3282_v21 }
 0x12c   :  { %v2373_v59 = vadd.f32 %v3262_v53, %v2332_v56 }
 0x12e   :  { %v2414_v2 = vadd.f32 %v3284_v62, %v2373_v59 }
 0x143   :  { %v3301_v23 = vpop.f32.mrf.mxu0 }
 0x144   :  { %v3323_v27 = vpop.f32.mrf.mxu1 }
 0x145   :  { %v3302_v28 = vpop.f32.mrf.mxu0 }
 0x146   :  { %v3324_v33 = vpop.f32.mrf.mxu1  ;;  %v3303_v57 = vadd.f32 %v3302_v28, %v3301_v23 }
 0x147   :  { %v3304_v34 = vpop.f32.mrf.mxu0  ;;  %v3325_v0 = vadd.f32 %v3324_v33, %v3323_v27 }
 0x148   :  { %v3326_v41 = vpop.f32.mrf.mxu1  ;;  %v2452_v63 = vadd.f32 %v3303_v57, %v2411_v58 }
 0x149   :  { %v3305_v42 = vpop.f32.mrf.mxu0 }
 0x14a   :  { %v3327_v49 = vpop.f32.mrf.mxu1  ;;  %v3306_v1 = vadd.f32 %v3305_v42, %v3304_v34  ;;  %v2493_v6 = vadd.f32 %v3325_v0, %v2452_v63 }
 0x14b   :  { %v3328_v8 = vadd.f32 %v3327_v49, %v3326_v41 }
 0x14c   :  { %v2455_v7 = vadd.f32 %v3306_v1, %v2414_v2 }
 0x14e   :  { %v2496_v14 = vadd.f32 %v3328_v8, %v2455_v7 }
 0x163   :  { %v3345_v46 = vpop.f32.mrf.mxu0 }
 0x164   :  { %v3367_v54 = vpop.f32.mrf.mxu1 }
 0x165   :  { %v3346_v55 = vpop.f32.mrf.mxu0 }
 0x166   :  { %v3368_v60 = vpop.f32.mrf.mxu1  ;;  %v3347_v3 = vadd.f32 %v3346_v55, %v3345_v46 }
 0x167   :  { %v3348_v61 = vpop.f32.mrf.mxu0  ;;  %v3369_v10 = vadd.f32 %v3368_v60, %v3367_v54 }
 0x168   :  { %v3370_v4 = vpop.f32.mrf.mxu1  ;;  %v2534_v9 = vadd.f32 %v3347_v3, %v2493_v6 }
 0x169   :  { %v3349_v5 = vpop.f32.mrf.mxu0 }
 0x16a   :  { %v3350_v11 = vadd.f32 %v3349_v5, %v3348_v61  ;;  %v3371_v12 = vpop.f32.mrf.mxu1  ;;  %v2575_v17 = vadd.f32 %v3369_v10, %v2534_v9 }
 0x16b   :  { %v3372_v22 = vadd.f32 %v3371_v12, %v3370_v4 }
 0x16c   :  { %v2537_v18 = vadd.f32 %v3350_v11, %v2496_v14 }
 0x16e   :  { %v2578_v26 = vadd.f32 %v3372_v22, %v2537_v18 }
 0x183   :  { %v3389_v13 = vpop.f32.mrf.mxu0 }
 0x184   :  { %v3411_v15 = vpop.f32.mrf.mxu1 }
 0x185   :  { %v3390_v16 = vpop.f32.mrf.mxu0 }
 0x186   :  { %v3391_v19 = vadd.f32 %v3390_v16, %v3389_v13  ;;  %v3412_v20 = vpop.f32.mrf.mxu1 }
 0x187   :  { %v3392_v21 = vpop.f32.mrf.mxu0  ;;  %v3413_v27 = vadd.f32 %v3412_v20, %v3411_v15 }
 0x188   :  { %v2616_v23 = vadd.f32 %v3391_v19, %v2575_v17  ;;  %v3414_v24 = vpop.f32.mrf.mxu1 }
 0x189   :  { %v3393_v25 = vpop.f32.mrf.mxu0 }
 0x18a   :  { %v3394_v28 = vadd.f32 %v3393_v25, %v3392_v21  ;;  %v3415_v29 = vpop.f32.mrf.mxu1  ;;  %v2657_v30 = vadd.f32 %v3413_v27, %v2616_v23 }
 0x18b   :  { %v3416_v32 = vadd.f32 %v3415_v29, %v3414_v24 }
 0x18c   :  { %v2619_v31 = vadd.f32 %v3394_v28, %v2578_v26  ;;  %v2663_v34 = vmax.f32 %v2657_v30, 0.0 }
 0x18e   :  { %v2660_v33 = vadd.f32 %v3416_v32, %v2619_v31 }
 0x190   :  { %v2664_v35 = vmax.f32 %v2660_v33, 0.0 }
 0x192   :  { %v2665_v36 = vpack.c.bf16 %v2664_v35, %v2663_v34 }
 0x194   :  { %3452 = vmatmul.mubr.bf16.vlgmr.msra.gmra.mxu0 %v2665_v36 }
 0x254   :  { %v2771_v41 = vpop.f32.mrf.mxu0 }
 0x255   :  { %v2772_v44 = vadd.f32 %v3135_v40, %v2771_v41 }
 0x256   :  { %v3453_v42 = vpop.f32.mrf.mxu0 }
 0x257   :  { %v2778_v48 = vmax.f32 %v2772_v44, 0.0 }
 0x258   :  { %v2774_v45 = vpop.f32.mrf.mxu0 }
 0x259   :  { %v2775_v46 = vadd.f32 %v3135_v40, %v2774_v45 }
 0x25a   :  { %v3454_v47 = vpop.f32.mrf.mxu0 }
 0x25b   :  { %v2779_v49 = vmax.f32 %v2775_v46, 0.0 }
 0x25d   :  { %v2780_v50 = vpack.c.bf16 %v2779_v49, %v2778_v48 }
 0x25f   :  { %3472 = vmatmul.mubr.bf16.vlgmr.msra.gmra.mxu1 %v2780_v50 }
 0x31f   :  { %v2886_v51 = vpop.f32.mrf.mxu1 }
 0x320   :  { %v2887_v43 = vadd.f32 %v3144_v52, %v2886_v51 }
 0x321   :  { %v3473_v53 = vpop.f32.mrf.mxu1 }
 0x322   :  { %v2895_v54 = vand.u32 2147483647, %v2887_v43  ;;  %v2893_v11 = vmin.f32 %v2887_v43, 0.0 }
 0x323   :  { %v2889_v55 = vpop.f32.mrf.mxu1 }
 0x324   :  { %v2897_v56 = vsub.f32 0.0, %v2895_v54  ;;  %v2890_v57 = vadd.f32 %v3144_v52, %v2889_v55 }
 0x325   :  { %v3474_v58 = vpop.f32.mrf.mxu1 }
 0x326   :  { %v2899_v59 = vmul.f32 1.442695, %v2897_v56  ;;  %v2896_v60 = vand.u32 2147483647, %v2890_v57  ;;  %v2894_v18 = vmin.f32 %v2890_v57, 0.0 }
 0x328   :  { %3761 = vpow2.f32 %v2899_v59  ;;  %v2898_v61 = vsub.f32 0.0, %v2896_v60 }
 0x32a   :  { %v2901_v62 = vmul.f32 1.442695, %v2898_v61 }
 0x32c   :  { %3763 = vpow2.f32 %v2901_v62 }
 0x335   :  { %v3762_v63 = vpop.eup %3761 }
 0x336   :  { %v2903_v0 = vadd.f32 1.0, %v3762_v63  ;;  %v2906_v3 = vmul.f32 -0.5, %v3762_v63  ;;  %v2909_v6 = vand.u32 2147483647, %v3762_v63 }
 0x338   :  { %3765 = vlog2.f32 %v2903_v0  ;;  %v2907_v4 = vadd.f32 1.0, %v2906_v3  ;;  %vm2910_vm1 = vcmp.lt.f32.partialorder %v2909_v6, 0.0004427343 }
 0x339   :  { %v3764_v1 = vpop.eup %3763 }
 0x33a   :  { %v2912_v2 = vadd.f32 1.0, %v3764_v1  ;;  %v2915_v5 = vmul.f32 -0.5, %v3764_v1  ;;  %v2908_v9 = vmul.f32 %v3762_v63, %v2907_v4  ;;  %v2918_v12 = vand.u32 2147483647, %v3764_v1 }
 0x33c   :  { %3767 = vlog2.f32 %v2912_v2  ;;  %v2916_v10 = vadd.f32 1.0, %v2915_v5  ;;  %vm2919_vm3 = vcmp.lt.f32.partialorder %v2918_v12, 0.0004427343 }
 0x33e   :  { %v2917_v17 = vmul.f32 %v3764_v1, %v2916_v10 }
 0x345   :  { %v3766_v7 = vpop.eup %3765 }
 0x346   :  { %v2905_v8 = vmul.f32 0.6931472, %v3766_v7 }
 0x348   :  { %v2911_v13 = vsel %vm2910_vm1, %v2908_v9, %v2905_v8 }
 0x349   :  { %v3768_v14 = vpop.eup %3767  ;;  %v2921_v15 = vsub.f32 %v2893_v11, %v2911_v13 }
 0x34a   :  { %v2914_v16 = vmul.f32 0.6931472, %v3768_v14 }
 0x34b   :  { %2924 = vst.msk [vmem:[#allocation2] sm:$0xff] %vm2923_vm2, %v2921_v15 }
 0x34c   :  { %v2920_v19 = vsel %vm2919_vm3, %v2917_v17, %v2914_v16 }
 0x34d   :  { %v2922_v20 = vsub.f32 %v2894_v18, %v2920_v19 }
 0x34f   :  { %2925 = vst.msk [vmem:[#allocation2 + $0x8] sm:$0xff] %vm2923_vm2, %v2922_v20 }
 0x350   :  { %2930 = vsyncadd [#allocation3], 224  ;;  %s3794_s4 = smov [#allocation2]  }
 0x351   :  { %s2931_s5 = sshll.u32 %s3794_s4, 4  ;;  %s2932_s5 = int_to_ptr.vmem [resolvable:$true] %s2931_s5 }
 0x352   :  { %s3769_s6 = scalar_lea.vmem %s2932_s5, 32  ;;  %s3773_s30 = scalar_lea.vmem %s2932_s5, 256 }
 0x353   :  { %p3770_p0 = scmp.ne.s32.totalorder %s2932_s5, %s3769_s6  ;;  %p3774_p1 = scmp.lt.s32.totalorder %s2932_s5, %s2932_s5 }
 0x354   :  { %p3775_p2 = scmp.lt.s32.totalorder %s3773_s30, %s3769_s6 }
 0x356   :  { %p3776_p3 = por %p3775_p2, %p3774_p1 }
 0x358   :  { %p3777_p4 = pnand %p3776_p3, %p3770_p0 }
 0x35a   :  { %3780 = shalt.err (!%p3777_p4)
}
 0x35b   :  { %s3795_s8 = smov 32   ;;  %s3796_s9 = smov 2  }
 0x35c   :  { %2937 = dma.vmem_to_hbm [thread:$0]  %s2932_s5, 32, %s4692_s7, [#allocation3], %s3795_s8, %s3795_s8, %s3796_s9  }
 0x35d   :  { %3789 = dma.done.wait [#allocation3], 256  }
 0x35e   :  { %3790 = vsyncadd [#allocation3], 4294967040 }
 0x35f   :  { %2941 = vsyncpa [#allocation3], 1 }

</bundles_post_ra>
